<compile_context>
chip_gen: v6e
topology: v6e:2x2x1
jax: 0.10.0
libtpu: 0.0.40
codegen_flags: <defaults>
</compile_context>

<pallas_src>
import functools

import jax
import jax.numpy as jnp
from jax.experimental import pallas as pl
from jax.experimental.pallas import tpu as pltpu


def _round_up(x, m):
    return ((x + m - 1) // m) * m


def _num_tensorcores_per_chip():
    """Crude per-chip TensorCore count (2 on v4/v5p/v7x, else 1)."""
    try:
        kind = jax.devices()[0].device_kind.lower()
    except Exception:
        return 1
    return 2 if any(t in kind for t in ("v7", "7x", "v5p", "v4")) else 1


_NUM_TC = _num_tensorcores_per_chip()


def _resident_spec(shape):
    """BlockSpec for an operand whose block never changes across grid steps."""
    try:
        return pl.BlockSpec(shape, lambda i: (0, 0), pipeline_mode=pl.Buffered(1))
    except Exception:  # older API without pipeline_mode: plain spec is still correct
        return pl.BlockSpec(shape, lambda i: (0, 0))


def mlp_kernel(x_ref, w1_ref, b1_ref, w2_ref, b2_ref, w3_ref, b3_ref, o_ref):
    # x tile arrives untransposed as (tb, F) f32; cast to bf16 in-kernel and
    # contract the feature axis of both operands: (H1, F) x (tb, F) -> (H1, tb).
    xb = x_ref[...].astype(jnp.bfloat16)
    h1 = jax.lax.dot_general(
        w1_ref[...], xb, (((1,), (1,)), ((), ())),
        preferred_element_type=jnp.float32)
    h1 = jnp.maximum(h1 + b1_ref[...], 0.0)                        # f32 (v5e-safe)

    # Layer 2: (H2, H1) @ (H1, tb) -> (H2, tb); bf16 MXU operands, f32 acc.
    h2 = jnp.dot(w2_ref[...], h1.astype(jnp.bfloat16),
                 preferred_element_type=jnp.float32)
    h2 = jnp.maximum(h2 + b2_ref[...], 0.0)

    # Output layer: (NO, H2) @ (H2, tb) -> (NO, tb).  For NO == 1 use a VPU
    # broadcast-multiply + cross-sublane reduce instead of an N=1 MXU pass.
    if w3_ref.shape[1] == 1:
        out = jnp.sum(h2 * w3_ref[...], axis=0, keepdims=True)      # (1, tb)
    else:
        out = jax.lax.dot_general(
            w3_ref[...], h2, (((0,), (0,)), ((), ())),
            preferred_element_type=jnp.float32)                     # (NO, tb)
    o_ref[...] = (out + b3_ref[...]).astype(o_ref.dtype)


@functools.partial(jax.jit, static_argnames=("tb",))
def net_forward(x, w1, b1, w2, b2, w3, b3, *, tb=None):
    """Forward pass of Net (inference).

    Native PyTorch layouts:
      x  : (B, F)        w1 : (128, F)   b1 : (128,)
      w2 : (64, 128)     b2 : (64,)
      w3 : (NO, 64)      b3 : (NO,)
    Returns (B, NO) float32.
    """
    B, F = x.shape
    H1 = w1.shape[0]
    H2 = w2.shape[0]
    NO = w3.shape[0]

    # Lane-aligned batch tile: one big tile (single TC), or a balanced 2-way
    # split on 2-TC chips.  Cap at 2048 to keep VMEM well below the scoped
    # default on every generation (incl. v7x's smaller VMEM).
    if tb is None:
        tiles = _NUM_TC if B > 128 else 1
        tb = min(2048, _round_up(pl.cdiv(B, tiles), 128))
    tb = max(128, _round_up(int(tb), 128))
    grid = (pl.cdiv(B, tb),)

    # Tiny weight/bias preps (bf16 MXU operands, column-vector biases); these
    # fuse under jit and are negligible next to the kernel.
    w1b = w1.astype(jnp.bfloat16)                       # (H1, F)
    w2b = w2.astype(jnp.bfloat16)                       # (H2, H1)
    w3t = w3.T.astype(jnp.float32)                      # (H2, NO)  VPU path stays f32
    b1c = b1.reshape(H1, 1).astype(jnp.float32)
    b2c = b2.reshape(H2, 1).astype(jnp.float32)
    b3c = b3.reshape(NO, 1).astype(jnp.float32)

    out_t = pl.pallas_call(
        mlp_kernel,
        out_shape=jax.ShapeDtypeStruct((NO, B), jnp.float32),
        grid_spec=pltpu.PrefetchScalarGridSpec(
            num_scalar_prefetch=0,
            grid=grid,
            in_specs=[
                pl.BlockSpec((tb, F), lambda i: (i, 0)),   # x tile (ragged last block OK)
                _resident_spec((H1, F)),                   # W1  (bf16, resident)
                _resident_spec((H1, 1)),                   # b1
                _resident_spec((H2, H1)),                  # W2  (bf16, resident)
                _resident_spec((H2, 1)),                   # b2
                _resident_spec((H2, NO)),                  # W3^T
                _resident_spec((NO, 1)),                   # b3
            ],
            out_specs=pl.BlockSpec((NO, tb), lambda i: (0, i)),   # lane-dense output
        ),
        compiler_params=pltpu.CompilerParams(
            dimension_semantics=("parallel",),
        ),
    )(x, w1b, b1c, w2b, b2c, w3t, b3c)

    return out_t.T                                       # (B, NO) float32


def reference_forward(x, w1, b1, w2, b2, w3, b3):
    h1 = jnp.maximum(x @ w1.T + b1, 0.0)
    h2 = jnp.maximum(h1 @ w2.T + b2, 0.0)
    return h2 @ w3.T + b3


if __name__ == "__main__":
    n_feature = 16
    n_output = 1
    batch = 200   # deliberately NOT a multiple of 128 -> exercises the ragged last tile

    key = jax.random.PRNGKey(0)
    kx, k1, k2, k3, kb1, kb2, kb3 = jax.random.split(key, 7)

    x = jax.random.normal(kx, (batch, n_feature), dtype=jnp.float32)

    # Deterministic init roughly matching torch.nn.Linear scaling (PyTorch layout).
    def init_linear(kw, kb, fan_in, fan_out):
        bound = 1.0 / jnp.sqrt(fan_in)
        w = jax.random.uniform(kw, (fan_out, fan_in), jnp.float32, -bound, bound)
        b = jax.random.uniform(kb, (fan_out,), jnp.float32, -bound, bound)
        return w, b

    w1, b1 = init_linear(k1, kb1, n_feature, 128)
    w2, b2 = init_linear(k2, kb2, 128, 64)
    w3, b3 = init_linear(k3, kb3, 64, n_output)

    out = net_forward(x, w1, b1, w2, b2, w3, b3)
    out = jax.block_until_ready(out)

    ref = reference_forward(x, w1, b1, w2, b2, w3, b3)
    assert out.shape == (batch, n_output)
    # bf16 MXU operands -> compare against the f32 reference with a looser tolerance.
    assert jnp.allclose(out, ref, atol=2e-2, rtol=2e-2), "mismatch vs. reference"

    print("KERNEL_OK")
</pallas_src>

<mosaic_0001>
module attributes {stable_mosaic.version = 11 : i64} {
  func.func @mlp_kernel(%arg0: i32, %arg1: memref<256x16xf32, #tpu.memory_space<vmem>>, %arg2: memref<128x16xbf16, #tpu.memory_space<vmem>>, %arg3: memref<128x1xf32, #tpu.memory_space<vmem>>, %arg4: memref<64x128xbf16, #tpu.memory_space<vmem>>, %arg5: memref<64x1xf32, #tpu.memory_space<vmem>>, %arg6: memref<64x1xf32, #tpu.memory_space<vmem>>, %arg7: memref<1x1xf32, #tpu.memory_space<vmem>>, %arg8: memref<1x256xf32, #tpu.memory_space<vmem>>) attributes {dimension_semantics = [#tpu.dimension_semantics<parallel>], iteration_bounds = array<i64: 1>, scalar_prefetch = 0 : i64, scratch_operands = 0 : i64, tpu.core_type = #tpu.core_type<tc>, window_params = [{transform_indices = @transform_0, window_bounds = array<i64: 256, 16>}, {pipeline_mode = #tpu.pipeline_mode<synchronous>, transform_indices = @transform_1, window_bounds = array<i64: 128, 16>}, {pipeline_mode = #tpu.pipeline_mode<synchronous>, transform_indices = @transform_2, window_bounds = array<i64: 128, 1>}, {pipeline_mode = #tpu.pipeline_mode<synchronous>, transform_indices = @transform_3, window_bounds = array<i64: 64, 128>}, {pipeline_mode = #tpu.pipeline_mode<synchronous>, transform_indices = @transform_4, window_bounds = array<i64: 64, 1>}, {pipeline_mode = #tpu.pipeline_mode<synchronous>, transform_indices = @transform_5, window_bounds = array<i64: 64, 1>}, {pipeline_mode = #tpu.pipeline_mode<synchronous>, transform_indices = @transform_6, window_bounds = array<i64: 1, 1>}, {transform_indices = @transform_7, window_bounds = array<i64: 1, 256>}]} {
    %c0 = arith.constant 0 : index
    %c0_0 = arith.constant 0 : index
    %0 = vector.load %arg1[%c0, %c0_0] : memref<256x16xf32, #tpu.memory_space<vmem>>, vector<256x16xf32>
    %1 = arith.truncf %0 : vector<256x16xf32> to vector<256x16xbf16>
    %c0_1 = arith.constant 0 : index
    %c0_2 = arith.constant 0 : index
    %2 = vector.load %arg2[%c0_1, %c0_2] : memref<128x16xbf16, #tpu.memory_space<vmem>>, vector<128x16xbf16>
    %cst = arith.constant dense<0.000000e+00> : vector<128x256xf32>
    %3 = tpu.matmul %2, %1, %cst {dimension_numbers = #tpu.dot_dimension_numbers<[1], [1], [0], [0], [0, 0, 1, 0], [], []>} : vector<128x16xbf16>, vector<256x16xbf16>, vector<128x256xf32> -> vector<128x256xf32>
    %c0_3 = arith.constant 0 : index
    %c0_4 = arith.constant 0 : index
    %4 = vector.load %arg3[%c0_3, %c0_4] : memref<128x1xf32, #tpu.memory_space<vmem>>, vector<128x1xf32>
    %5 = vector.broadcast %4 : vector<128x1xf32> to vector<128x256xf32>
    %6 = arith.addf %3, %5 : vector<128x256xf32>
    %cst_5 = arith.constant 0.000000e+00 : f32
    %7 = vector.broadcast %cst_5 : f32 to vector<128x256xf32>
    %8 = arith.maximumf %6, %7 : vector<128x256xf32>
    %c0_6 = arith.constant 0 : index
    %c0_7 = arith.constant 0 : index
    %9 = vector.load %arg4[%c0_6, %c0_7] : memref<64x128xbf16, #tpu.memory_space<vmem>>, vector<64x128xbf16>
    %10 = arith.truncf %8 : vector<128x256xf32> to vector<128x256xbf16>
    %cst_8 = arith.constant dense<0.000000e+00> : vector<64x256xf32>
    %11 = tpu.matmul %9, %10, %cst_8 {dimension_numbers = #tpu.dot_dimension_numbers<[1], [0], [0], [1], [0, 0, 1, 1], [], []>} : vector<64x128xbf16>, vector<128x256xbf16>, vector<64x256xf32> -> vector<64x256xf32>
    %c0_9 = arith.constant 0 : index
    %c0_10 = arith.constant 0 : index
    %12 = vector.load %arg5[%c0_9, %c0_10] : memref<64x1xf32, #tpu.memory_space<vmem>>, vector<64x1xf32>
    %13 = vector.broadcast %12 : vector<64x1xf32> to vector<64x256xf32>
    %14 = arith.addf %11, %13 : vector<64x256xf32>
    %cst_11 = arith.constant 0.000000e+00 : f32
    %15 = vector.broadcast %cst_11 : f32 to vector<64x256xf32>
    %16 = arith.maximumf %14, %15 : vector<64x256xf32>
    %c0_12 = arith.constant 0 : index
    %c0_13 = arith.constant 0 : index
    %17 = vector.load %arg6[%c0_12, %c0_13] : memref<64x1xf32, #tpu.memory_space<vmem>>, vector<64x1xf32>
    %18 = vector.broadcast %17 : vector<64x1xf32> to vector<64x256xf32>
    %19 = arith.mulf %16, %18 : vector<64x256xf32>
    %cst_14 = arith.constant dense<0.000000e+00> : vector<256xf32>
    %20 = vector.multi_reduction <add>, %19, %cst_14 [0] : vector<64x256xf32> to vector<256xf32>
    %21 = vector.shape_cast %20 : vector<256xf32> to vector<1x256xf32>
    %c0_15 = arith.constant 0 : index
    %c0_16 = arith.constant 0 : index
    %22 = vector.load %arg7[%c0_15, %c0_16] : memref<1x1xf32, #tpu.memory_space<vmem>>, vector<1x1xf32>
    %23 = vector.broadcast %22 : vector<1x1xf32> to vector<1x256xf32>
    %24 = arith.addf %21, %23 : vector<1x256xf32>
    %c0_17 = arith.constant 0 : index
    %c0_18 = arith.constant 0 : index
    %25 = vector.load %arg8[%c0_17, %c0_18] : memref<1x256xf32, #tpu.memory_space<vmem>>, vector<1x256xf32>
    tpu.vector_store %arg8[%c0_17, %c0_18], %24 {strides = array<i32>} : memref<1x256xf32, #tpu.memory_space<vmem>>, vector<1x256xf32>,
    return
  }
  func.func @transform_0(%arg0: i32) -> (i32, i32) {
    %c0_i32 = arith.constant 0 : i32
    %c0_i32_0 = arith.constant 0 : i32
    return %arg0, %c0_i32 : i32, i32
  }
  func.func @transform_1(%arg0: i32) -> (i32, i32) {
    %c0_i32 = arith.constant 0 : i32
    %c0_i32_0 = arith.constant 0 : i32
    %c0_i32_1 = arith.constant 0 : i32
    return %c0_i32, %c0_i32_0 : i32, i32
  }
  func.func @transform_2(%arg0: i32) -> (i32, i32) {
    %c0_i32 = arith.constant 0 : i32
    %c0_i32_0 = arith.constant 0 : i32
    %c0_i32_1 = arith.constant 0 : i32
    return %c0_i32, %c0_i32_0 : i32, i32
  }
  func.func @transform_3(%arg0: i32) -> (i32, i32) {
    %c0_i32 = arith.constant 0 : i32
    %c0_i32_0 = arith.constant 0 : i32
    %c0_i32_1 = arith.constant 0 : i32
    return %c0_i32, %c0_i32_0 : i32, i32
  }
  func.func @transform_4(%arg0: i32) -> (i32, i32) {
    %c0_i32 = arith.constant 0 : i32
    %c0_i32_0 = arith.constant 0 : i32
    %c0_i32_1 = arith.constant 0 : i32
    return %c0_i32, %c0_i32_0 : i32, i32
  }
  func.func @transform_5(%arg0: i32) -> (i32, i32) {
    %c0_i32 = arith.constant 0 : i32
    %c0_i32_0 = arith.constant 0 : i32
    %c0_i32_1 = arith.constant 0 : i32
    return %c0_i32, %c0_i32_0 : i32, i32
  }
  func.func @transform_6(%arg0: i32) -> (i32, i32) {
    %c0_i32 = arith.constant 0 : i32
    %c0_i32_0 = arith.constant 0 : i32
    %c0_i32_1 = arith.constant 0 : i32
    return %c0_i32, %c0_i32_0 : i32, i32
  }
  func.func @transform_7(%arg0: i32) -> (i32, i32) {
    %c0_i32 = arith.constant 0 : i32
    %c0_i32_0 = arith.constant 0 : i32
    return %c0_i32, %arg0 : i32, i32
  }
}

</mosaic_0001>

<bundles_post_ra>
// kernel: net_forward.1
= control target key start
LH: loop header
LB: loop body
LE: loop exit
PB: predicated region body
PF: predicated region fallthrough
CT: control target
= control target key end

     0   :  { %s1265_s0 = inlined_call_operand.vmem [shape: f32[200,16], index: 0, kind: input, shape index: {}]   ;;  %s1266_s1 = inlined_call_operand.vmem [shape: bf16[128,16], index: 1, kind: input, shape index: {}]   ;;  %s1267_s2 = inlined_call_operand.vmem [shape: f32[128,1], index: 2, kind: input, shape index: {}]   ;;  %s1268_s3 = inlined_call_operand.vmem [shape: bf16[64,128], index: 3, kind: input, shape index: {}]   ;;  %s1269_s4 = inlined_call_operand.vmem [shape: f32[64,1], index: 4, kind: input, shape index: {}]   ;;  %s1270_s5 = inlined_call_operand.vmem [shape: f32[64,1], index: 5, kind: input, shape index: {}]   ;;  %s1271_s6 = inlined_call_operand.<no memory space> [shape: f32[1,1], index: 6, kind: input, shape index: {}]   ;;  %s1272_s7 = inlined_call_operand.hbm [shape: f32[1,200], index: 7, kind: output, shape index: {}]  }
   0x1   :  { %v12_v0 = vstv %s1271_s6 }
   0x2   :  { %13 = vst [vmem:[#allocation2] sm:$0x1] %v12_v0 }
   0x3   :  { %v60_v1 = vld [vmem:[%s1265_s0 + $0xf0] sm:$0xff]  ;;  %v61_v2 = vld [vmem:[%s1265_s0 + $0xf8] sm:$0xff]  ;;  %vm230_vm0 = vcmask 130048   ;;  %v58_v6 = vld [vmem:[%s1265_s0 + $0xe0] sm:$0xff]  ;;  %v871_v8 = vmov 0  }
   0x4   :  { %v44_v3 = vld [vmem:[%s1265_s0 + $0x70] sm:$0xff]  ;;  %v77_v4 = vpack.c.bf16 %v61_v2, %v60_v1  ;;  %v45_v5 = vld [vmem:[%s1265_s0 + $0x78] sm:$0xff]  ;;  %v59_v7 = vld [vmem:[%s1265_s0 + $0xe8] sm:$0xff]  ;;  %835 = vset.pattern.permute.xlu0 %v871_v8  ;;  %836 = vset.pattern.permute.xlu1 %v871_v8 }
   0x5   :  { %v69_v9 = vpack.c.bf16 %v45_v5, %v44_v3  ;;  %v76_v10 = vpack.c.bf16 %v59_v7, %v58_v6  ;;  %576 = vmatprep.mubr.bf16.mxu1 %v871_v8  ;;  %v42_v11 = vld [vmem:[%s1265_s0 + $0x60] sm:$0xff]  ;;  %v43_v12 = vld [vmem:[%s1265_s0 + $0x68] sm:$0xff]  ;;  %v56_v15 = vld [vmem:[%s1265_s0 + $0xd0] sm:$0xff] }
   0x6   :  { %824 = vmatprep.subr.msk.bf16.mxu0 %vm230_vm0, %v77_v4  ;;  %v68_v14 = vpack.c.bf16 %v43_v12, %v42_v11  ;;  %v57_v16 = vld [vmem:[%s1265_s0 + $0xd8] sm:$0xff]  ;;  %v40_v19 = vld [vmem:[%s1265_s0 + $0x50] sm:$0xff]  ;;  %v963_v21 = vld [vmem:[%s1266_s1] sm:$0xff]  }
   0x7   :  { %v277_v13 = vsel %vm230_vm0, %v69_v9, 0  ;;  %v75_v18 = vpack.c.bf16 %v57_v16, %v56_v15  ;;  %v41_v20 = vld [vmem:[%s1265_s0 + $0x58] sm:$0xff]  ;;  %808 = vmatprep.mubr.msk.bf16.mxu0 %vm230_vm0, %v963_v21  ;;  %v54_v23 = vld [vmem:[%s1265_s0 + $0xc0] sm:$0xff]  ;;  %v55_v24 = vld [vmem:[%s1265_s0 + $0xc8] sm:$0xff] }
   0x8   :  { %793 = vmatpush3.bf16.xpose.msra.mxu0 %v277_v13  ;;  %v274_v17 = vsel %vm230_vm0, %v68_v14, 0  ;;  %v67_v22 = vpack.c.bf16 %v41_v20, %v40_v19  ;;  %v108_v25 = vld [vmem:[%s1267_s2 + $0x70] sm:$0xff]  ;;  %v106_v26 = vld [vmem:[%s1267_s2 + $0x60] sm:$0xff]  ;;  %v74_v28 = vpack.c.bf16 %v55_v24, %v54_v23  ;;  %v109_v29 = vld [vmem:[%s1267_s2 + $0x78] sm:$0xff] }
   0x9   :  { %825 = vmatprep.subr.msk.bf16.mxu0 %vm230_vm0, %v76_v10  ;;  %182 = vperm.xlu0 %835, %v108_v25   ;;  %v38_v30 = vld [vmem:[%s1265_s0 + $0x40] sm:$0xff]  ;;  %v39_v31 = vld [vmem:[%s1265_s0 + $0x48] sm:$0xff]  ;;  %v104_v34 = vld [vmem:[%s1267_s2 + $0x50] sm:$0xff] }
   0xa   :  { %v271_v27 = vsel %vm230_vm0, %v67_v22, 0  ;;  %172 = vperm.xlu1 %836, %v106_v26   ;;  %v107_v32 = vld [vmem:[%s1267_s2 + $0x68] sm:$0xff]  ;;  %v66_v33 = vpack.c.bf16 %v39_v31, %v38_v30  ;;  %v52_v35 = vld [vmem:[%s1265_s0 + $0xb0] sm:$0xff]  ;;  %v53_v36 = vld [vmem:[%s1265_s0 + $0xb8] sm:$0xff] }
   0xb   :  { %v105_v37 = vld [vmem:[%s1267_s2 + $0x58] sm:$0xff]  ;;  %v73_v39 = vpack.c.bf16 %v53_v36, %v52_v35  ;;  %v102_v40 = vld [vmem:[%s1267_s2 + $0x40] sm:$0xff]  ;;  %v36_v41 = vld [vmem:[%s1265_s0 + $0x30] sm:$0xff] }
   0xc   :  { %v268_v38 = vsel %vm230_vm0, %v66_v33, 0  ;;  %v37_v42 = vld [vmem:[%s1265_s0 + $0x38] sm:$0xff]  ;;  %v103_v43 = vld [vmem:[%s1267_s2 + $0x48] sm:$0xff]  ;;  %v50_v44 = vld [vmem:[%s1265_s0 + $0xa0] sm:$0xff] }
   0xd   :  { %187 = vperm.xlu0 %835, %v109_v29   ;;  %v51_v45 = vld [vmem:[%s1265_s0 + $0xa8] sm:$0xff]  ;;  %v100_v46 = vld [vmem:[%s1267_s2 + $0x30] sm:$0xff]  ;;  %v101_v47 = vld [vmem:[%s1267_s2 + $0x38] sm:$0xff]  ;;  %v65_v48 = vpack.c.bf16 %v37_v42, %v36_v41 }
   0xe   :  { %177 = vperm.xlu1 %836, %v107_v32  }
  0x10   :  { %795 = vmatpush3.bf16.xpose.msra.mxu0 %v274_v17 }
  0x11   :  { %826 = vmatprep.subr.msk.bf16.mxu0 %vm230_vm0, %v75_v18  ;;  %162 = vperm.xlu0 %835, %v104_v34  }
  0x12   :  { %167 = vperm.xlu1 %836, %v105_v37  }
  0x15   :  { %152 = vperm.xlu0 %835, %v102_v40  }
  0x16   :  { %157 = vperm.xlu1 %836, %v103_v43  }
  0x18   :  { %797 = vmatpush3.bf16.xpose.msra.mxu0 %v271_v27 }
  0x19   :  { %827 = vmatprep.subr.msk.bf16.mxu0 %vm230_vm0, %v74_v28 }
  0x20   :  { %799 = vmatpush3.bf16.xpose.msra.mxu0 %v268_v38 }
  0x21   :  { %828 = vmatprep.subr.msk.bf16.mxu0 %vm230_vm0, %v73_v39 }
  0x22   :  { %14 = vsyncpa [#allocation4], 0  ;;  %142 = vperm.xlu0 %835, %v100_v46   ;;  %v265_v49 = vsel %vm230_vm0, %v65_v48, 0  ;;  %v72_v50 = vpack.c.bf16 %v51_v45, %v50_v44  ;;  %147 = vperm.xlu1 %836, %v101_v47   ;;  %v98_v51 = vld [vmem:[%s1267_s2 + $0x20] sm:$0xff]  ;;  %v35_v53 = vld [vmem:[%s1265_s0 + $0x28] sm:$0xff] }
  0x23   :  { %v34_v52 = vld [vmem:[%s1265_s0 + $0x20] sm:$0xff]  ;;  %v99_v54 = vld [vmem:[%s1267_s2 + $0x28] sm:$0xff]  ;;  %v96_v56 = vld [vmem:[%s1267_s2 + $0x10] sm:$0xff] }
  0x24   :  { %v64_v55 = vpack.c.bf16 %v35_v53, %v34_v52  ;;  %v48_v57 = vld [vmem:[%s1265_s0 + $0x90] sm:$0xff]  ;;  %v49_v58 = vld [vmem:[%s1265_s0 + $0x98] sm:$0xff]  ;;  %v94_v62 = vld [vmem:[%s1267_s2] sm:$0xff] }
  0x25   :  { %v97_v59 = vld [vmem:[%s1267_s2 + $0x18] sm:$0xff]  ;;  %v71_v61 = vpack.c.bf16 %v49_v58, %v48_v57  ;;  %v32_v63 = vld [vmem:[%s1265_s0 + $0x10] sm:$0xff]  ;;  %v95_v1 = vld [vmem:[%s1267_s2 + $0x8] sm:$0xff] }
  0x26   :  { %132 = vperm.xlu0 %835, %v98_v51   ;;  %137 = vperm.xlu1 %836, %v99_v54   ;;  %v262_v60 = vsel %vm230_vm0, %v64_v55, 0  ;;  %v33_v0 = vld [vmem:[%s1265_s0 + $0x18] sm:$0xff]  ;;  %v472_v3 = vld [vmem:[%s1269_s4] sm:$0xff]  ;;  %v47_v5 = vld [vmem:[%s1265_s0 + $0x88] sm:$0xff] }
  0x27   :  { %v63_v2 = vpack.c.bf16 %v33_v0, %v32_v63  ;;  %v46_v4 = vld [vmem:[%s1265_s0 + $0x80] sm:$0xff]  ;;  %v473_v6 = vld [vmem:[%s1269_s4 + $0x8] sm:$0xff]  ;;  %v474_v10 = vld [vmem:[%s1269_s4 + $0x10] sm:$0xff] }
  0x28   :  { %801 = vmatpush3.bf16.xpose.msra.mxu0 %v265_v49  ;;  %v70_v9 = vpack.c.bf16 %v47_v5, %v46_v4  ;;  %v30_v11 = vld [vmem:[%s1265_s0] sm:$0xff]  ;;  %v31_v12 = vld [vmem:[%s1265_s0 + $0x8] sm:$0xff]  ;;  %v475_v13 = vld [vmem:[%s1269_s4 + $0x18] sm:$0xff] }
  0x29   :  { %829 = vmatprep.subr.msk.bf16.mxu0 %vm230_vm0, %v72_v50  ;;  %v259_v7 = vsel %vm230_vm0, %v63_v2, 0  ;;  %v62_v14 = vpack.c.bf16 %v31_v12, %v30_v11  ;;  %v633_v15 = vld [vmem:[%s1270_s5] sm:$0xff]  ;;  %v634_v16 = vld [vmem:[%s1270_s5 + $0x8] sm:$0xff]  ;;  %v635_v19 = vld [vmem:[%s1270_s5 + $0x10] sm:$0xff] }
  0x2a   :  { %122 = vperm.xlu0 %835, %v96_v56   ;;  %127 = vperm.xlu1 %836, %v97_v59   ;;  %v476_v18 = vld [vmem:[%s1269_s4 + $0x20] sm:$0xff]  ;;  %v477_v20 = vld [vmem:[%s1269_s4 + $0x28] sm:$0xff]  ;;  %v636_v22 = vld [vmem:[%s1270_s5 + $0x18] sm:$0xff] }
  0x2b   :  { %v256_v17 = vsel %vm230_vm0, %v62_v14, 0  ;;  %v838_v23 = vld [vmem:[%s1266_s1 + $0x8] sm:$0xff]   ;;  %v478_v24 = vld [vmem:[%s1269_s4 + $0x30] sm:$0xff]  ;;  %v637_v25 = vld [vmem:[%s1270_s5 + $0x20] sm:$0xff] }
  0x2c   :  { %v479_v26 = vld [vmem:[%s1269_s4 + $0x38] sm:$0xff]  ;;  %v638_v27 = vld [vmem:[%s1270_s5 + $0x28] sm:$0xff]  ;;  %v839_v28 = vld [vmem:[%s1266_s1 + $0x10] sm:$0xff]  }
  0x2d   :  { %v640_v29 = vld [vmem:[%s1270_s5 + $0x38] sm:$0xff]  ;;  %v723_v30 = vld [vmem:[#allocation2] sm:$0x1]  ;;  %v842_v33 = vld [vmem:[%s1266_s1 + $0x28] sm:$0xff]  }
  0x2e   :  { %112 = vperm.xlu0 %835, %v94_v62   ;;  %117 = vperm.xlu1 %836, %v95_v1   ;;  %v840_v31 = vld [vmem:[%s1266_s1 + $0x18] sm:$0xff]   ;;  %v841_v32 = vld [vmem:[%s1266_s1 + $0x20] sm:$0xff]   ;;  %v843_v34 = vld [vmem:[%s1266_s1 + $0x30] sm:$0xff]  }
  0x2f   :  { %v844_v35 = vld [vmem:[%s1266_s1 + $0x38] sm:$0xff]  }
  0x30   :  { %803 = vmatpush3.bf16.xpose.msra.mxu0 %v262_v60 }
  0x31   :  { %830 = vmatprep.subr.msk.bf16.mxu0 %vm230_vm0, %v71_v61 }
  0x32   :  { %482 = vperm.xlu0 %835, %v472_v3   ;;  %487 = vperm.xlu1 %836, %v473_v6  }
  0x36   :  { %492 = vperm.xlu0 %835, %v474_v10   ;;  %497 = vperm.xlu1 %836, %v475_v13  }
  0x38   :  { %805 = vmatpush3.bf16.xpose.msra.mxu0 %v259_v7 }
  0x39   :  { %831 = vmatprep.subr.msk.bf16.mxu0 %vm230_vm0, %v70_v9 }
  0x3a   :  { %643 = vperm.xlu0 %835, %v633_v15   ;;  %648 = vperm.xlu1 %836, %v634_v16  }
  0x3e   :  { %502 = vperm.xlu0 %835, %v476_v18   ;;  %653 = vperm.xlu1 %836, %v635_v19  }
  0x40   :  { %807 = vmatpush3.bf16.xpose.msra.mxu0 %v256_v17 }
  0x42   :  { %507 = vperm.xlu0 %835, %v477_v20   ;;  %658 = vperm.xlu1 %836, %v636_v22  }
  0x46   :  { %512 = vperm.xlu0 %835, %v478_v24   ;;  %663 = vperm.xlu1 %836, %v637_v25  }
  0x47   :  { %809 = vmatmul.mubr.msk.bf16.vlgmr.msra.gmra.mxu0 %vm230_vm0, %v963_v21  ;;  %v639_v21 = vld [vmem:[%s1270_s5 + $0x30] sm:$0xff] }
  0x48   :  { %810 = vmatprep.mubr.msk.bf16.mxu0 %vm230_vm0, %v838_v23 }
  0x4a   :  { %517 = vperm.xlu0 %835, %v479_v26   ;;  %668 = vperm.xlu1 %836, %v638_v27  }
  0x4e   :  { %673 = vperm.xlu0 %835, %v639_v21   ;;  %678 = vperm.xlu1 %836, %v640_v29  }
  0x4f   :  { %811 = vmatmul.mubr.msk.bf16.gmra.mxu0 %vm230_vm0, %v838_v23 }
  0x50   :  { %812 = vmatprep.mubr.msk.bf16.mxu0 %vm230_vm0, %v839_v28 }
  0x52   :  { %726 = vperm.xlu0 %835, %v723_v30  }
  0x57   :  { %813 = vmatmul.mubr.msk.bf16.gmra.mxu0 %vm230_vm0, %v839_v28 }
  0x58   :  { %814 = vmatprep.mubr.msk.bf16.mxu0 %vm230_vm0, %v840_v31 }
  0x5f   :  { %815 = vmatmul.mubr.msk.bf16.gmra.mxu0 %vm230_vm0, %v840_v31 }
  0x60   :  { %816 = vmatprep.mubr.msk.bf16.mxu0 %vm230_vm0, %v841_v32 }
  0x67   :  { %817 = vmatmul.mubr.msk.bf16.gmra.mxu0 %vm230_vm0, %v841_v32 }
  0x68   :  { %818 = vmatprep.mubr.msk.bf16.mxu0 %vm230_vm0, %v842_v33 }
  0x6f   :  { %819 = vmatmul.mubr.msk.bf16.gmra.mxu0 %vm230_vm0, %v842_v33 }
  0x70   :  { %820 = vmatprep.mubr.msk.bf16.mxu0 %vm230_vm0, %v843_v34 }
  0x77   :  { %821 = vmatmul.mubr.msk.bf16.gmra.mxu0 %vm230_vm0, %v843_v34 }
  0x78   :  { %822 = vmatprep.mubr.msk.bf16.mxu0 %vm230_vm0, %v844_v35 }
  0x7f   :  { %823 = vmatmul.mubr.msk.bf16.gmra.mxu0 %vm230_vm0, %v844_v35 }
  0x84   :  { %v1172_v36 = vpop.permute.xlu0 %182 }
  0x85   :  { %v1174_v37 = vpop.permute.xlu1 %172 }
  0x88   :  { %v1176_v38 = vpop.permute.xlu0 %187 }
  0x89   :  { %v1178_v39 = vpop.permute.xlu1 %177 }
  0x8c   :  { %v1180_v40 = vpop.permute.xlu0 %162 }
  0x8d   :  { %v1182_v41 = vpop.permute.xlu1 %167 }
  0x90   :  { %v1184_v42 = vpop.permute.xlu0 %152 }
  0x91   :  { %v1186_v43 = vpop.permute.xlu1 %157 }
  0x9d   :  { %v1188_v44 = vpop.permute.xlu0 %142  ;;  %v1190_v45 = vpop.permute.xlu1 %147 }
  0xa1   :  { %v1192_v46 = vpop.permute.xlu0 %132  ;;  %v1194_v47 = vpop.permute.xlu1 %137 }
  0xa5   :  { %v123_v48 = vpop.permute.xlu0 %122  ;;  %v128_v49 = vpop.permute.xlu1 %127 }
  0xa9   :  { %v113_v50 = vpop.permute.xlu0 %112  ;;  %v118_v53 = vpop.permute.xlu1 %117 }
 0x107   :  { %v337_v51 = vpop.f32.mrf.mxu0 }
 0x108   :  { %v338_v54 = vadd.f32 %v337_v51, %v113_v50 }
 0x109   :  { %v339_v52 = vpop.f32.mrf.mxu0 }
 0x10a   :  { %v340_v56 = vadd.f32 %v339_v52, %v113_v50  ;;  %v416_v59 = vmax.f32 %v338_v54, 0.0 }
 0x10b   :  { %v341_v55 = vpop.f32.mrf.mxu0 }
 0x10c   :  { %v342_v57 = vadd.f32 %v341_v55, %v118_v53  ;;  %v417_v63 = vmax.f32 %v340_v56, 0.0 }
 0x10d   :  { %v343_v58 = vpop.f32.mrf.mxu0 }
 0x10e   :  { %v418_v60 = vmax.f32 %v342_v57, 0.0  ;;  %v344_v61 = vadd.f32 %v343_v58, %v118_v53 }
 0x10f   :  { %v347_v62 = vpop.f32.mrf.mxu0 }
 0x110   :  { %v1196_v0 = vpack.c.bf16 %v418_v60, %v416_v59  ;;  %v419_v1 = vmax.f32 %v344_v61, 0.0  ;;  %v348_v4 = vadd.f32 %v347_v62, %v123_v48 }
 0x111   :  { %v349_v2 = vpop.f32.mrf.mxu0 }
 0x112   :  { %v1198_v3 = vpack.c.bf16 %v419_v1, %v417_v63  ;;  %v350_v6 = vadd.f32 %v349_v2, %v123_v48  ;;  %v420_v10 = vmax.f32 %v348_v4, 0.0 }
 0x113   :  { %v351_v5 = vpop.f32.mrf.mxu0 }
 0x114   :  { %v352_v7 = vadd.f32 %v351_v5, %v128_v49  ;;  %v421_v14 = vmax.f32 %v350_v6, 0.0 }
 0x115   :  { %v353_v9 = vpop.f32.mrf.mxu0 }
 0x116   :  { %v422_v11 = vmax.f32 %v352_v7, 0.0  ;;  %v354_v12 = vadd.f32 %v353_v9, %v128_v49 }
 0x117   :  { %v1200_v13 = vpop.f32.mrf.mxu0 }
 0x118   :  { %v1202_v15 = vpack.c.bf16 %v422_v11, %v420_v10  ;;  %v423_v16 = vmax.f32 %v354_v12, 0.0 }
 0x119   :  { %v1204_v17 = vpop.f32.mrf.mxu0 }
 0x11a   :  { %v1206_v18 = vpack.c.bf16 %v423_v16, %v421_v14 }
 0x11b   :  { %v1208_v19 = vpop.f32.mrf.mxu0 }
 0x11d   :  { %v1210_v20 = vpop.f32.mrf.mxu0 }
 0x11f   :  { %v1212_v22 = vpop.f32.mrf.mxu0 }
 0x121   :  { %v369_v23 = vpop.f32.mrf.mxu0 }
 0x123   :  { %v371_v24 = vpop.f32.mrf.mxu0 }
 0x125   :  { %v373_v25 = vpop.f32.mrf.mxu0 }
 0x127   :  { %v377_v26 = vpop.f32.mrf.mxu0 }
 0x129   :  { %v379_v27 = vpop.f32.mrf.mxu0 }
 0x12b   :  { %v381_v28 = vpop.f32.mrf.mxu0 }
 0x12d   :  { %v383_v21 = vpop.f32.mrf.mxu0 }
 0x12f   :  { %v387_v29 = vpop.f32.mrf.mxu0 }
 0x130   :  { %v388_v12 = vadd.f32 %v387_v29, %v1180_v40 }
 0x131   :  { %v389_v30 = vpop.f32.mrf.mxu0 }
 0x132   :  { %v390_v5 = vadd.f32 %v389_v30, %v1180_v40  ;;  %v382_v30 = vadd.f32 %v381_v28, %v1186_v43  ;;  %v370_v40 = vadd.f32 %v369_v23, %v1188_v44 }
 0x133   :  { %v391_v31 = vpop.f32.mrf.mxu0 }
 0x134   :  { %v392_v7 = vadd.f32 %v391_v31, %v1182_v41  ;;  %v437_v16 = vmax.f32 %v390_v5, 0.0  ;;  %v429_v23 = vmax.f32 %v370_v40, 0.0 }
 0x135   :  { %v393_v32 = vpop.f32.mrf.mxu0 }
 0x136   :  { %v394_v61 = vadd.f32 %v393_v32, %v1182_v41  ;;  %v438_v32 = vmax.f32 %v392_v7, 0.0  ;;  %v374_v41 = vadd.f32 %v373_v25, %v1190_v45  ;;  %v368_v25 = vadd.f32 %v1212_v22, %v1188_v44 }
 0x137   :  { %v397_v33 = vpop.f32.mrf.mxu0 }
 0x138   :  { %v398_v2 = vadd.f32 %v397_v33, %v1174_v37  ;;  %v431_v28 = vmax.f32 %v374_v41, 0.0 }
 0x139   :  { %v399_v34 = vpop.f32.mrf.mxu0 }
 0x13a   :  { %v400_v57 = vadd.f32 %v399_v34, %v1174_v37  ;;  %v440_v14 = vmax.f32 %v398_v2, 0.0  ;;  %v380_v37 = vadd.f32 %v379_v27, %v1184_v42  ;;  %v372_v27 = vadd.f32 %v371_v24, %v1190_v45 }
 0x13b   :  { %v401_v35 = vpop.f32.mrf.mxu0  ;;  %v362_v45 = vadd.f32 %v1208_v19, %v1194_v47 }
 0x13c   :  { %v402_v59 = vadd.f32 %v401_v35, %v1178_v39  ;;  %v441_v6 = vmax.f32 %v400_v57, 0.0  ;;  %v436_v35 = vmax.f32 %v388_v12, 0.0  ;;  %v433_v29 = vmax.f32 %v380_v37, 0.0 }
 0x13d   :  { %v403_v48 = vpop.f32.mrf.mxu0  ;;  %v430_v24 = vmax.f32 %v372_v27, 0.0  ;;  %v426_v22 = vmax.f32 %v362_v45, 0.0 }
 0x13e   :  { %v404_v52 = vadd.f32 %v403_v48, %v1178_v39  ;;  %v442_v9 = vmax.f32 %v402_v59, 0.0  ;;  %v439_v39 = vmax.f32 %v394_v61, 0.0  ;;  %v434_v48 = vmax.f32 %v382_v30, 0.0 }
 0x13f   :  { %v407_v49 = vpop.f32.mrf.mxu0 }
 0x140   :  { %v408_v55 = vadd.f32 %v407_v49, %v1172_v36  ;;  %v443_v62 = vmax.f32 %v404_v52, 0.0  ;;  %v468_v33 = vpack.c.bf16 %v442_v9, %v440_v14  ;;  %v467_v34 = vpack.c.bf16 %v439_v39, %v437_v16 }
 0x141   :  { %v409_v50 = vpop.f32.mrf.mxu0  ;;  %v466_v49 = vpack.c.bf16 %v438_v32, %v436_v35 }
 0x142   :  { %v410_v53 = vadd.f32 %v409_v50, %v1172_v36  ;;  %v444_v4 = vmax.f32 %v408_v55, 0.0  ;;  %v469_v11 = vpack.c.bf16 %v443_v62, %v441_v6 }
 0x143   :  { %v411_v51 = vpop.f32.mrf.mxu0 }
 0x144   :  { %v412_v54 = vadd.f32 %v411_v51, %v1176_v38  ;;  %v445_v63 = vmax.f32 %v410_v53, 0.0  ;;  %v463_v53 = vpack.c.bf16 %v431_v28, %v429_v23 }
 0x145   :  { %v413_v56 = vpop.f32.mrf.mxu0 }
 0x146   :  { %v414_v58 = vadd.f32 %v413_v56, %v1176_v38  ;;  %v446_v60 = vmax.f32 %v412_v54, 0.0  ;;  %v384_v38 = vadd.f32 %v383_v21, %v1186_v43  ;;  %v378_v21 = vadd.f32 %v377_v26, %v1184_v42 }
 0x147   :  { %v364_v43 = vadd.f32 %v1210_v20, %v1194_v47  ;;  %v360_v42 = vadd.f32 %v1204_v17, %v1192_v46  ;;  %v358_v20 = vadd.f32 %v1200_v13, %v1192_v46  ;;  %v428_v54 = vmax.f32 %v368_v25, 0.0  ;;  %v845_v46 = vld [vmem:[%s1268_s3] sm:$0xff]   ;;  %v846_v47 = vld [vmem:[%s1268_s3 + $0x8] sm:$0xff]   ;;  %v483_v13 = vpop.permute.xlu0 %482 }
 0x148   :  { %v447_v1 = vmax.f32 %v414_v58, 0.0  ;;  %v470_v10 = vpack.c.bf16 %v446_v60, %v444_v4  ;;  %v435_v31 = vmax.f32 %v384_v38, 0.0  ;;  %v432_v51 = vmax.f32 %v378_v21, 0.0 }
 0x149   :  { %v427_v52 = vmax.f32 %v364_v43, 0.0  ;;  %v425_v44 = vmax.f32 %v360_v42, 0.0  ;;  %v462_v55 = vpack.c.bf16 %v430_v24, %v428_v54  ;;  %v424_v17 = vmax.f32 %v358_v20, 0.0 }
 0x14a   :  { %v471_v36 = vpack.c.bf16 %v447_v1, %v445_v63  ;;  %v465_v50 = vpack.c.bf16 %v435_v31, %v433_v29  ;;  %v464_v26 = vpack.c.bf16 %v434_v48, %v432_v51 }
 0x14b   :  { %v461_v56 = vpack.c.bf16 %v427_v52, %v425_v44  ;;  %v460_v57 = vpack.c.bf16 %v426_v22, %v424_v17 }
 0x14c   :  { %544 = vmatprep.subr.bf16.mxu1 %v471_v36 }
 0x14d   :  { %545 = vmatpush1.bf16.msra.mxu1 %v470_v10 }
 0x14e   :  { %546 = vmatprep.subr.bf16.mxu1 %v469_v11 }
 0x151   :  { %547 = vmatpush1.bf16.msra.mxu1 %v468_v33 }
 0x152   :  { %548 = vmatprep.subr.bf16.mxu1 %v467_v34 }
 0x155   :  { %549 = vmatpush1.bf16.msra.mxu1 %v466_v49 }
 0x156   :  { %550 = vmatprep.subr.bf16.mxu1 %v465_v50 }
 0x159   :  { %551 = vmatpush1.bf16.msra.mxu1 %v464_v26 }
 0x15a   :  { %552 = vmatprep.subr.bf16.mxu1 %v463_v53 }
 0x15d   :  { %553 = vmatpush1.bf16.msra.mxu1 %v462_v55 }
 0x15e   :  { %554 = vmatprep.subr.bf16.mxu1 %v461_v56 }
 0x161   :  { %555 = vmatpush1.bf16.msra.mxu1 %v460_v57 }
 0x162   :  { %556 = vmatprep.subr.bf16.mxu1 %v1206_v18  ;;  %v493_v18 = vpop.permute.xlu0 %492 }
 0x165   :  { %557 = vmatpush1.bf16.msra.mxu1 %v1202_v15  ;;  %v488_v15 = vpop.permute.xlu1 %487 }
 0x166   :  { %558 = vmatprep.subr.bf16.mxu1 %v1198_v3  ;;  %v847_v3 = vld [vmem:[%s1268_s3 + $0x10] sm:$0xff]   ;;  %v644_v58 = vpop.permute.xlu0 %643 }
 0x169   :  { %559 = vmatpush1.bf16.msra.mxu1 %v1196_v0  ;;  %v848_v0 = vld [vmem:[%s1268_s3 + $0x18] sm:$0xff]   ;;  %v498_v19 = vpop.permute.xlu1 %497  ;;  %s873_s3 = smov [#allocation3]  }
 0x16a   :  { %v503_v62 = vpop.permute.xlu0 %502  ;;  %s764_s2 = sshll.u32 %s873_s3, 4  ;;  %s765_s2 = int_to_ptr.vmem [resolvable:$true] %s764_s2 }
 0x16b   :  { %s849_s27 = scalar_lea.vmem %s765_s2, 32  ;;  %p854_p1 = scmp.lt.s32.totalorder %s765_s2, %s765_s2 }
 0x16c   :  { %577 = vmatmul.mubr.bf16.vlgmr.msra.gmra.mxu1 %v845_v46  ;;  %p850_p0 = scmp.ne.s32.totalorder %s765_s2, %s849_s27  ;;  %p855_p2 = scmp.lt.s32.totalorder %s849_s27, %s849_s27 }
 0x16d   :  { %586 = vmatprep.mubr.bf16.mxu1 %v871_v8  ;;  %v649_v60 = vpop.permute.xlu1 %648 }
 0x16e   :  { %v508_v5 = vpop.permute.xlu0 %507  ;;  %p856_p3 = por %p855_p2, %p854_p1 }
 0x170   :  { %p857_p4 = pnand %p856_p3, %p850_p0 }
 0x171   :  { %v654_v2 = vpop.permute.xlu1 %653 }
 0x172   :  { %v513_v30 = vpop.permute.xlu0 %512 }
 0x174   :  { %587 = vmatmul.mubr.bf16.gmra.mxu1 %v846_v47 }
 0x175   :  { %596 = vmatprep.mubr.bf16.mxu1 %v871_v8  ;;  %v659_v39 = vpop.permute.xlu1 %658 }
 0x176   :  { %v518_v24 = vpop.permute.xlu0 %517 }
 0x179   :  { %v664_v43 = vpop.permute.xlu1 %663 }
 0x17c   :  { %597 = vmatmul.mubr.bf16.gmra.mxu1 %v847_v3 }
 0x17d   :  { %606 = vmatprep.mubr.bf16.mxu1 %v871_v8 }
 0x184   :  { %607 = vmatmul.mubr.bf16.gmra.mxu1 %v848_v0  ;;  %v669_v0 = vpop.permute.xlu1 %668 }
 0x22c   :  { %v578_v59 = vpop.f32.mrf.mxu1 }
 0x22d   :  { %v579_v36 = vadd.f32 %v578_v59, %v483_v13 }
 0x22e   :  { %v580_v61 = vpop.f32.mrf.mxu1 }
 0x22f   :  { %v581_v38 = vadd.f32 %v580_v61, %v483_v13  ;;  %v617_v16 = vmax.f32 %v579_v36, 0.0  ;;  %v674_v61 = vpop.permute.xlu0 %673 }
 0x230   :  { %v582_v63 = vpop.f32.mrf.mxu1 }
 0x231   :  { %v583_v8 = vadd.f32 %v582_v63, %v488_v15  ;;  %v618_v34 = vmax.f32 %v581_v38, 0.0  ;;  %v681_v48 = vmul.f32 %v644_v58, %v617_v16 }
 0x232   :  { %v584_v1 = vpop.f32.mrf.mxu1 }
 0x233   :  { %v585_v7 = vadd.f32 %v584_v1, %v488_v15  ;;  %v619_v11 = vmax.f32 %v583_v8, 0.0  ;;  %v682_v23 = vmul.f32 %v644_v58, %v618_v34 }
 0x234   :  { %v588_v4 = vpop.f32.mrf.mxu1 }
 0x235   :  { %v589_v9 = vadd.f32 %v588_v4, %v493_v18  ;;  %v620_v32 = vmax.f32 %v585_v7, 0.0  ;;  %v683_v35 = vmul.f32 %v649_v60, %v619_v11 }
 0x236   :  { %v590_v6 = vpop.f32.mrf.mxu1 }
 0x237   :  { %v591_v12 = vadd.f32 %v590_v6, %v493_v18  ;;  %v621_v33 = vmax.f32 %v589_v9, 0.0  ;;  %v684_v28 = vmul.f32 %v649_v60, %v620_v32  ;;  %v697_v26 = vadd.f32 %v683_v35, %v681_v48 }
 0x238   :  { %v592_v10 = vpop.f32.mrf.mxu1 }
 0x239   :  { %v593_v14 = vadd.f32 %v592_v10, %v498_v19  ;;  %v622_v40 = vmax.f32 %v591_v12, 0.0  ;;  %v685_v50 = vmul.f32 %v654_v2, %v621_v33  ;;  %v710_v55 = vadd.f32 %v684_v28, %v682_v23 }
 0x23a   :  { %v594_v37 = vpop.f32.mrf.mxu1  ;;  %v729_v33 = vlaneseq }
 0x23b   :  { %v595_v41 = vadd.f32 %v594_v37, %v498_v19  ;;  %v623_v29 = vmax.f32 %v593_v14, 0.0  ;;  %v686_v52 = vmul.f32 %v654_v2, %v622_v40  ;;  %v698_v56 = vadd.f32 %v697_v26, %v685_v50 }
 0x23c   :  { %v598_v31 = vpop.f32.mrf.mxu1  ;;  %v730_v35 = vshrl.u32 %v729_v33, 7  ;;  %vm755_vm1 = vcmp.lt.s32.totalorder %v729_v33, 256 }
 0x23d   :  { %v599_v21 = vadd.f32 %v598_v31, %v503_v62  ;;  %v624_v25 = vmax.f32 %v595_v41, 0.0  ;;  %v687_v53 = vmul.f32 %v659_v39, %v623_v29  ;;  %v711_v13 = vadd.f32 %v710_v55, %v686_v52 }
 0x23e   :  { %v600_v27 = vpop.f32.mrf.mxu1  ;;  %v731_v28 = vsub.s32 0, %v730_v35 }
 0x23f   :  { %v601_v49 = vadd.f32 %v600_v27, %v503_v62  ;;  %v625_v51 = vmax.f32 %v599_v21, 0.0  ;;  %v688_v17 = vmul.f32 %v659_v39, %v624_v25  ;;  %v699_v15 = vadd.f32 %v698_v56, %v687_v53  ;;  %v679_v39 = vpop.permute.xlu1 %678 }
 0x240   :  { %v602_v42 = vpop.f32.mrf.mxu1 }
 0x241   :  { %v603_v45 = vadd.f32 %v602_v42, %v508_v5  ;;  %v626_v20 = vmax.f32 %v601_v49, 0.0  ;;  %v689_v57 = vmul.f32 %v664_v43, %v625_v51  ;;  %v712_v62 = vadd.f32 %v711_v13, %v688_v17  ;;  %v727_v51 = vpop.permute.xlu0 %726 }
 0x242   :  { %v604_v54 = vpop.f32.mrf.mxu1  ;;  %v872_v49 = vmov 1966171168  }
 0x243   :  { %v627_v44 = vmax.f32 %v603_v45, 0.0  ;;  %v605_v22 = vadd.f32 %v604_v54, %v508_v5  ;;  %v690_v18 = vmul.f32 %v664_v43, %v626_v20  ;;  %v700_v63 = vadd.f32 %v699_v15, %v689_v57 }
 0x244   :  { %v608_v46 = vpop.f32.mrf.mxu1  ;;  %v739_v43 = vunpack.c.l.s4 %v872_v49 }
 0x245   :  { %v628_v47 = vmax.f32 %v605_v22, 0.0  ;;  %v609_v3 = vadd.f32 %v608_v46, %v513_v30  ;;  %v691_v58 = vmul.f32 %v669_v0, %v627_v44  ;;  %v713_v6 = vadd.f32 %v712_v62, %v690_v18 }
 0x246   :  { %v610_v19 = vpop.f32.mrf.mxu1  ;;  %v740_v45 = vunpack.c.0.s8 %v739_v43 }
 0x247   :  { %v629_v59 = vmax.f32 %v609_v3, 0.0  ;;  %v611_v60 = vadd.f32 %v610_v19, %v513_v30  ;;  %v692_v2 = vmul.f32 %v669_v0, %v628_v47  ;;  %v701_v7 = vadd.f32 %v700_v63, %v691_v58 }
 0x248   :  { %v612_v1 = vpop.f32.mrf.mxu1  ;;  %v743_v20 = vsub.s32 %v740_v45, %v730_v35 }
 0x249   :  { %v693_v4 = vmul.f32 %v674_v61, %v629_v59  ;;  %v630_v5 = vmax.f32 %v611_v60, 0.0  ;;  %v613_v8 = vadd.f32 %v612_v1, %v518_v24  ;;  %v714_v11 = vadd.f32 %v713_v6, %v692_v2 }
 0x24a   :  { %v614_v36 = vpop.f32.mrf.mxu1 }
 0x24b   :  { %v694_v9 = vmul.f32 %v674_v61, %v630_v5  ;;  %v631_v10 = vmax.f32 %v613_v8, 0.0  ;;  %v615_v38 = vadd.f32 %v614_v36, %v518_v24  ;;  %v702_v12 = vadd.f32 %v701_v7, %v693_v4 }
 0x24c   :  { %v732_v24 = vrot.slane %v727_v51, %v731_v28 }
 0x24d   :  { %v695_v14 = vmul.f32 %v679_v39, %v631_v10  ;;  %v632_v37 = vmax.f32 %v615_v38, 0.0  ;;  %v715_v16 = vadd.f32 %v714_v11, %v694_v9 }
 0x24f   :  { %v703_v30 = vadd.f32 %v702_v12, %v695_v14  ;;  %v696_v32 = vmul.f32 %v679_v39, %v632_v37 }
 0x251   :  { %v704_v41 = vrot.slane %v703_v30, 4  ;;  %v716_v31 = vadd.f32 %v715_v16, %v696_v32 }
 0x253   :  { %v705_v34 = vadd.f32 %v704_v41, %v703_v30  ;;  %v717_v21 = vrot.slane %v716_v31, 4 }
 0x255   :  { %v706_v40 = vrot.slane %v705_v34, 2  ;;  %v718_v29 = vadd.f32 %v717_v21, %v716_v31 }
 0x257   :  { %v707_v27 = vadd.f32 %v706_v40, %v705_v34  ;;  %v719_v48 = vrot.slane %v718_v29, 2 }
 0x259   :  { %v708_v50 = vrot.slane %v707_v27, 1  ;;  %v720_v25 = vadd.f32 %v719_v48, %v718_v29 }
 0x25b   :  { %v709_v42 = vadd.f32 %v708_v50, %v707_v27  ;;  %v721_v23 = vrot.slane %v720_v25, 1 }
 0x25d   :  { %v722_v26 = vadd.f32 %v721_v23, %v720_v25  ;;  %v733_v52 = vadd.f32 %v732_v24, %v709_v42 }
 0x25f   :  { %v734_v53 = vadd.f32 %v732_v24, %v722_v26 }
 0x261   :  { %v737_v54 = vcombine.low %v733_v52, %v734_v53 }
 0x263   :  { %v744_v44 = vrot.slane %v737_v54, %v743_v20 }
 0x265   :  { %v751_v22 = vrot.slane %v744_v44, %v743_v20 }
 0x267   :  { %757 = vst.msk [vmem:[#allocation3] sm:$0x3] %vm755_vm1, %v751_v22 }
 0x268   :  { %860 = shalt.err (!%p857_p4)
}
 0x269   :  { %767 = dma.vmem_to_hbm [thread:$0]  %s765_s2, 32, %s1272_s7, [#allocation4]  }
 0x26a   :  { %869 = dma.done.wait [#allocation4], 32  }
 0x26b   :  { %870 = vsyncadd [#allocation4], 4294967264 }
 0x26c   :  { %771 = vsyncpa [#allocation4], 1 }

</bundles_post_ra>
